<compile_context>
chip_gen: v6e
topology: v6e:2x2x1
jax: 0.10.0
libtpu: 0.0.40
codegen_flags: <defaults>
</compile_context>

<pallas_src>
import functools
import math

import jax
import jax.numpy as jnp
from jax.experimental import pallas as pl
from jax.experimental.pallas import tpu as pltpu


def _round_up(x, m):
    return (x + m - 1) // m * m


def dot_attention_kernel(dec_ref, enc_ref, out_ref, *, scaled):
    # dec_ref: [TB, H], enc_ref: [TB, L, H], out_ref: [TB, H]
    enc = enc_ref[...].astype(jnp.float32)          # [TB, L, H]
    dec = dec_ref[...].astype(jnp.float32)          # [TB, H]

    # scores[t, l] = <enc[t, l, :], dec[t, :]>   (VPU mul + lane reduce)
    scores = jnp.sum(enc * dec[:, None, :], axis=-1)     # [TB, L]

    if scaled:
        scores = scores * (1.0 / math.sqrt(float(enc.shape[-1])))

    # softmax over the sequence (lane) axis, batch rows independent
    m = jnp.max(scores, axis=-1, keepdims=True)           # [TB, 1]
    e = jnp.exp(scores - m)                                # [TB, L]
    s = jnp.sum(e, axis=-1, keepdims=True)                 # [TB, 1]

    # context = sum_l e[t,l] * enc[t,l,:], normalized afterwards (folded 1/s)
    ctx = jnp.sum(e[:, :, None] * enc, axis=1)             # [TB, H]
    ctx = ctx * pl.reciprocal(s, approx=True)              # [TB, H]

    out_ref[...] = ctx.astype(out_ref.dtype)


def _choose_tb(B, L, H, itemsize, vmem_budget_bytes=16 << 20):
    """Pick a batch-block size TB (multiple of 8) from a double-buffered
    VMEM budget: ~2 * (TB*L*H + 2*TB*H) * itemsize plus f32 intermediates."""
    per_row = (L * H + 2 * H) * itemsize          # enc + dec + out, per batch row
    per_row = 2 * per_row + 2 * L * H * 4         # double-buffer + f32 temps
    tb = max(8, (vmem_budget_bytes // max(per_row, 1)) // 8 * 8)
    tb = min(tb, _round_up(B, 8))
    return tb


def dot_attention(dec_hid, enc_hids, scaled=True):
    """dec_hid: [B, H], enc_hids: [B, L, H] -> context: [B, H]."""
    B, H = dec_hid.shape
    Be, L, He = enc_hids.shape
    assert B == Be and H == He

    itemsize = jnp.dtype(enc_hids.dtype).itemsize
    TB = _choose_tb(B, L, H, itemsize)

    # Pad the batch so every grid step sees a full (TB, ...) block.
    B_pad = _round_up(B, TB)
    if B_pad != B:
        dec_hid = jnp.pad(dec_hid, ((0, B_pad - B), (0, 0)))
        enc_hids = jnp.pad(enc_hids, ((0, B_pad - B), (0, 0), (0, 0)))

    out = pl.pallas_call(
        functools.partial(dot_attention_kernel, scaled=scaled),
        out_shape=jax.ShapeDtypeStruct((B_pad, H), dec_hid.dtype),
        grid=(B_pad // TB,),
        in_specs=[
            pl.BlockSpec((TB, H), lambda b: (b, 0)),
            pl.BlockSpec((TB, L, H), lambda b: (b, 0, 0)),
        ],
        out_specs=pl.BlockSpec((TB, H), lambda b: (b, 0)),
        compiler_params=pltpu.CompilerParams(
            dimension_semantics=("parallel",),
            vmem_limit_bytes=64 << 20,
        ),
    )(dec_hid, enc_hids)

    return out[:B]


def dot_attention_ref(dec_hid, enc_hids, scaled=True):
    # pure-JAX reference of the intended semantics
    scores = jnp.einsum("blh,bh->bl",
                        enc_hids.astype(jnp.float32),
                        dec_hid.astype(jnp.float32))
    if scaled:
        scores = scores * (1.0 / jnp.sqrt(jnp.float32(dec_hid.shape[-1])))
    attn = jax.nn.softmax(scores, axis=1)
    return jnp.einsum("bl,blh->bh", attn, enc_hids.astype(jnp.float32))


if __name__ == "__main__":
    # Small shapes consistent with the module: hid_size=32 -> feature dim 64.
    B, L, hid_size = 2, 8, 32
    H = hid_size * 2

    key = jax.random.PRNGKey(0)
    k_dec, k_enc = jax.random.split(key)
    dec_hid = jax.random.normal(k_dec, (B, H), dtype=jnp.float32)
    enc_hids = jax.random.normal(k_enc, (B, L, H), dtype=jnp.float32)

    ctx = dot_attention(dec_hid, enc_hids, scaled=True)
    jax.block_until_ready(ctx)

    ctx_ref = dot_attention_ref(dec_hid, enc_hids, scaled=True)
    assert ctx.shape == (B, H)
    # approx reciprocal (EUP) has ~1e-4 relative error; tolerance accordingly.
    assert jnp.allclose(ctx, ctx_ref, atol=2e-3, rtol=2e-3), "mismatch vs reference"

    print("KERNEL_OK")
</pallas_src>

<mosaic_0001>
module attributes {stable_mosaic.version = 11 : i64} {
  func.func @dot_attention_kernel(%arg0: i32, %arg1: memref<8x64xf32, #tpu.memory_space<vmem>>, %arg2: memref<8x8x64xf32, #tpu.memory_space<vmem>>, %arg3: memref<8x64xf32, #tpu.memory_space<vmem>>) attributes {dimension_semantics = [#tpu.dimension_semantics<parallel>], iteration_bounds = array<i64: 1>, scalar_prefetch = 0 : i64, scratch_operands = 0 : i64, tpu.core_type = #tpu.core_type<tc>, window_params = [{transform_indices = @transform_0, window_bounds = array<i64: 8, 64>}, {transform_indices = @transform_1, window_bounds = array<i64: 8, 8, 64>}, {transform_indices = @transform_2, window_bounds = array<i64: 8, 64>}]} {
    %c0 = arith.constant 0 : index
    %c0_0 = arith.constant 0 : index
    %c0_1 = arith.constant 0 : index
    %0 = vector.load %arg2[%c0, %c0_0, %c0_1] : memref<8x8x64xf32, #tpu.memory_space<vmem>>, vector<8x8x64xf32>
    %c0_2 = arith.constant 0 : index
    %c0_3 = arith.constant 0 : index
    %1 = vector.load %arg1[%c0_2, %c0_3] : memref<8x64xf32, #tpu.memory_space<vmem>>, vector<8x64xf32>
    %2 = vector.shape_cast %1 : vector<8x64xf32> to vector<8x1x64xf32>
    %3 = vector.broadcast %2 : vector<8x1x64xf32> to vector<8x8x64xf32>
    %4 = arith.mulf %0, %3 : vector<8x8x64xf32>
    %cst = arith.constant dense<0.000000e+00> : vector<8x8xf32>
    %5 = vector.multi_reduction <add>, %4, %cst [2] : vector<8x8x64xf32> to vector<8x8xf32>
    %cst_4 = arith.constant 1.250000e-01 : f32
    %6 = vector.broadcast %cst_4 : f32 to vector<8x8xf32>
    %7 = arith.mulf %5, %6 : vector<8x8xf32>
    %cst_5 = arith.constant dense<0xFF800000> : vector<8xf32>
    %8 = vector.multi_reduction <maximumf>, %7, %cst_5 [1] : vector<8x8xf32> to vector<8xf32>
    %9 = vector.shape_cast %8 : vector<8xf32> to vector<8x1xf32>
    %10 = vector.broadcast %9 : vector<8x1xf32> to vector<8x8xf32>
    %11 = arith.subf %7, %10 : vector<8x8xf32>
    %12 = math.exp %11 : vector<8x8xf32>
    %cst_6 = arith.constant dense<0.000000e+00> : vector<8xf32>
    %13 = vector.multi_reduction <add>, %12, %cst_6 [1] : vector<8x8xf32> to vector<8xf32>
    %14 = vector.shape_cast %13 : vector<8xf32> to vector<8x1xf32>
    %15 = vector.shape_cast %12 : vector<8x8xf32> to vector<8x8x1xf32>
    %16 = vector.broadcast %15 : vector<8x8x1xf32> to vector<8x8x64xf32>
    %17 = arith.mulf %16, %0 : vector<8x8x64xf32>
    %cst_7 = arith.constant dense<0.000000e+00> : vector<8x64xf32>
    %18 = vector.multi_reduction <add>, %17, %cst_7 [1] : vector<8x8x64xf32> to vector<8x64xf32>
    %19 = tpu.reciprocal %14 {approx = true} : vector<8x1xf32> -> vector<8x1xf32>
    %20 = vector.broadcast %19 : vector<8x1xf32> to vector<8x64xf32>
    %21 = arith.mulf %18, %20 : vector<8x64xf32>
    %c0_8 = arith.constant 0 : index
    %c0_9 = arith.constant 0 : index
    %22 = vector.load %arg3[%c0_8, %c0_9] : memref<8x64xf32, #tpu.memory_space<vmem>>, vector<8x64xf32>
    tpu.vector_store %arg3[%c0_8, %c0_9], %21 {strides = array<i32>} : memref<8x64xf32, #tpu.memory_space<vmem>>, vector<8x64xf32>,
    return
  }
  func.func @transform_0(%arg0: i32) -> (i32, i32) {
    %c0_i32 = arith.constant 0 : i32
    %c0_i32_0 = arith.constant 0 : i32
    return %arg0, %c0_i32 : i32, i32
  }
  func.func @transform_1(%arg0: i32) -> (i32, i32, i32) {
    %c0_i32 = arith.constant 0 : i32
    %c0_i32_0 = arith.constant 0 : i32
    %c0_i32_1 = arith.constant 0 : i32
    return %arg0, %c0_i32, %c0_i32_0 : i32, i32, i32
  }
  func.func @transform_2(%arg0: i32) -> (i32, i32) {
    %c0_i32 = arith.constant 0 : i32
    %c0_i32_0 = arith.constant 0 : i32
    return %arg0, %c0_i32 : i32, i32
  }
}

</mosaic_0001>

<bundles_post_ra>
// kernel: tpu_custom_call.1
= control target key start
LH: loop header
LB: loop body
LE: loop exit
PB: predicated region body
PF: predicated region fallthrough
CT: control target
= control target key end

     0   :  { %7 = vsyncpa [#allocation3], 0  ;;  %s754_s0 = inlined_call_operand.hbm [shape: f32[8,64], index: 0, kind: input, shape index: {}]   ;;  %s755_s1 = inlined_call_operand.hbm [shape: f32[8,8,64], index: 1, kind: input, shape index: {}]   ;;  %s756_s2 = inlined_call_operand.hbm [shape: f32[8,64], index: 2, kind: output, shape index: {}]  }
   0x1   :  { %8 = vsyncpa [#allocation6], 0 }
   0x2   :  { %9 = vsyncpa [#allocation4], 0  ;;  %s610_s9 = smov [#allocation2]   ;;  %s611_s11 = smov [#allocation5]  }
   0x3   :  { %s16_s10 = sshll.u32 %s610_s9, 4  ;;  %s25_s12 = sshll.u32 %s611_s11, 4  ;;  %s17_s10 = int_to_ptr.vmem [resolvable:$true] %s16_s10  ;;  %s26_s12 = int_to_ptr.vmem [resolvable:$true] %s25_s12 }
   0x4   :  { %s552_s13 = scalar_lea.vmem %s17_s10, 128  ;;  %p557_p1 = scmp.lt.s32.totalorder %s17_s10, %s17_s10 }
   0x5   :  { %p553_p0 = scmp.ne.s32.totalorder %s17_s10, %s552_s13  ;;  %p558_p2 = scmp.lt.s32.totalorder %s552_s13, %s552_s13 }
   0x7   :  { %p559_p3 = por %p558_p2, %p557_p1 }
   0x9   :  { %p560_p4 = pnand %p559_p3, %p553_p0 }
   0xb   :  { %563 = shalt.err (!%p560_p4)
}
   0xc   :  { %19 = dma.hbm_to_vmem [thread:$0]  %s754_s0, 128, %s17_s10, [#allocation3]  }
   0xd   :  { %s572_s16 = scalar_lea.vmem %s26_s12, 1024  ;;  %p577_p6 = scmp.lt.s32.totalorder %s26_s12, %s26_s12 }
   0xe   :  { %p573_p5 = scmp.ne.s32.totalorder %s26_s12, %s572_s16  ;;  %p578_p7 = scmp.lt.s32.totalorder %s572_s16, %s572_s16 }
  0x10   :  { %p579_p8 = por %p578_p7, %p577_p6 }
  0x12   :  { %p580_p9 = pnand %p579_p8, %p573_p5 }
  0x14   :  { %583 = shalt.err (!%p580_p9)
}
  0x15   :  { %s612_s17 = smov 128   ;;  %s613_s18 = smov 8  }
  0x16   :  { %31 = dma.hbm_to_vmem [thread:$0]  %s755_s1, 1024, %s26_s12, [#allocation6], %s612_s17, %s612_s17, %s613_s18  }
  0x17   :  { %604 = dma.done.wait [#allocation3], 128  }
  0x18   :  { %605 = vsyncadd [#allocation3], 4294967168 }
  0x19   :  { %606 = dma.done.wait [#allocation6], 1024  }
  0x1a   :  { %607 = vsyncadd [#allocation6], 4294966272  ;;  %v52_v0 = vlaneseq  ;;  %v614_v1 = vmov 1966171168   ;;  %v46_v8 = vld [vmem:[#allocation2] sm:$0xff]  ;;  %v647_v15 = vld [vmem:[#allocation5] sm:$0xff] }
  0x1b   :  { %v50_v2 = vunpack.c.l.s4 %v614_v1  ;;  %v48_v9 = vcombine.high %v46_v8, %v46_v8  ;;  %vm145_vm0 = vcmask 523264   ;;  %v650_v20 = vld [vmem:[#allocation5 + $0x10] sm:$0xff]  ;;  %v652_v21 = vld [vmem:[#allocation5 + $0x8] sm:$0xff]  ;;  %v657_v27 = vld [vmem:[#allocation5 + $0x20] sm:$0xff]  ;;  %vm220_vm1 = vcmask 1041409   ;;  %s616_s0 = smov [#allocation7]  }
  0x1c   :  { %v638_v3 = vshrl.u32 %v52_v0, 7  ;;  %v187_v4 = vand.u32 127, %v52_v0  ;;  %v659_v28 = vld [vmem:[#allocation5 + $0x18] sm:$0xff]  ;;  %v667_v37 = vld [vmem:[#allocation5 + $0x28] sm:$0xff]  ;;  %v674_v44 = vld [vmem:[#allocation5 + $0x30] sm:$0xff]  ;;  %vm222_vm2 = vcmask 1042434  }
  0x1d   :  { %v51_v5 = vunpack.c.0.s8 %v50_v2  ;;  %v679_v48 = vld [vmem:[#allocation5 + $0x38] sm:$0xff]  ;;  %vm224_vm3 = vcmask 1043459   ;;  %vm226_vm4 = vcmask 1044484   ;;  %vm228_vm5 = vcmask 1045509   ;;  %s506_s1 = sshll.u32 %s616_s0, 4  ;;  %s507_s1 = int_to_ptr.vmem [resolvable:$true] %s506_s1 }
  0x1e   :  { %v641_v6 = vsub.s32 %v187_v4, %v638_v3  ;;  %v645_v11 = vsub.s32 0, %v638_v3  ;;  %vm230_vm6 = vcmask 1046534   ;;  %vm232_vm7 = vcmask 1047559   ;;  %s584_s21 = scalar_lea.vmem %s507_s1, 128  ;;  %p589_p11 = scmp.lt.s32.totalorder %s507_s1, %s507_s1 }
  0x1f   :  { %v54_v7 = vsub.s32 %v51_v5, %v638_v3  ;;  %vm235_vm8 = vcmask 64512   ;;  %p585_p10 = scmp.ne.s32.totalorder %s507_s1, %s584_s21  ;;  %p590_p12 = scmp.lt.s32.totalorder %s584_s21, %s584_s21 }
  0x21   :  { %v55_v10 = vrot.slane %v46_v8, %v54_v7  ;;  %v62_v14 = vrot.slane %v48_v9, %v54_v7  ;;  %p591_p13 = por %p590_p12, %p589_p11 }
  0x23   :  { %v71_v12 = vrot.slane %v55_v10, %v54_v7  ;;  %v63_v13 = vcombine.high %v55_v10, %v55_v10  ;;  %v78_v19 = vrot.slane %v62_v14, %v54_v7  ;;  %v64_v22 = vcombine.high %v62_v14, %v62_v14  ;;  %p592_p0 = pnand %p591_p13, %p585_p10 }
  0x25   :  { %v100_v16 = vrot.slane %v71_v12, %v645_v11  ;;  %v93_v17 = vcombine.high %v71_v12, %v71_v12  ;;  %v85_v18 = vrot.slane %v63_v13, %v54_v7  ;;  %v116_v29 = vrot.slane %v78_v19, %v645_v11 }
  0x26   :  { %v92_v30 = vrot.slane %v64_v22, %v54_v7  ;;  %v94_v31 = vcombine.high %v78_v19, %v78_v19 }
  0x27   :  { %v137_v23 = vmul.f32 %v100_v16, %v647_v15  ;;  %v108_v24 = vrot.slane %v93_v17, %v645_v11  ;;  %v104_v25 = vrot.slane %v85_v18, %v645_v11  ;;  %v95_v26 = vcombine.high %v85_v18, %v85_v18 }
  0x28   :  { %v141_v36 = vmul.f32 %v116_v29, %v657_v27  ;;  %v120_v38 = vrot.slane %v92_v30, %v645_v11  ;;  %v96_v39 = vcombine.high %v92_v30, %v92_v30  ;;  %v124_v43 = vrot.slane %v94_v31, %v645_v11 }
  0x29   :  { %v146_v32 = vsel %vm145_vm0, %v137_v23, 0.0  ;;  %v139_v33 = vmul.f32 %v108_v24, %v650_v20  ;;  %v138_v34 = vmul.f32 %v104_v25, %v652_v21  ;;  %v112_v35 = vrot.slane %v95_v26, %v645_v11 }
  0x2a   :  { %147 = vadd.xlane.f32.xlu0 %v146_v32  ;;  %v142_v46 = vmul.f32 %v120_v38, %v667_v37  ;;  %v128_v47 = vrot.slane %v96_v39, %v645_v11  ;;  %v158_v49 = vsel %vm145_vm0, %v141_v36, 0.0  ;;  %v143_v50 = vmul.f32 %v124_v43, %v674_v44 }
  0x2b   :  { %v152_v40 = vsel %vm145_vm0, %v139_v33, 0.0  ;;  %v149_v41 = vsel %vm145_vm0, %v138_v34, 0.0  ;;  %v140_v42 = vmul.f32 %v112_v35, %v659_v28  ;;  %v615_v31 = vmov 0  }
  0x2c   :  { %153 = vadd.xlane.f32.xlu1 %v152_v40  ;;  %v161_v51 = vsel %vm145_vm0, %v142_v46, 0.0  ;;  %v144_v52 = vmul.f32 %v128_v47, %v679_v48  ;;  %v164_v53 = vsel %vm145_vm0, %v143_v50, 0.0  ;;  %524 = vset.pattern.permute.xlu0 %v615_v31  ;;  %v246_v32 = vsub.s32 1, %v638_v3 }
  0x2d   :  { %v155_v45 = vsel %vm145_vm0, %v140_v42, 0.0  ;;  %523 = vset.pattern.permute.xlu1 %v615_v31  ;;  %v250_v33 = vsub.s32 2, %v638_v3  ;;  %v254_v34 = vsub.s32 3, %v638_v3  ;;  %v258_v40 = vsub.s32 4, %v638_v3 }
  0x2e   :  { %150 = vadd.xlane.f32.xlu0 %v149_v41  ;;  %v167_v54 = vsel %vm145_vm0, %v144_v52, 0.0 }
  0x30   :  { %156 = vadd.xlane.f32.xlu1 %v155_v45 }
  0x32   :  { %159 = vadd.xlane.f32.xlu0 %v158_v49  ;;  %v262_v49 = vsub.s32 5, %v638_v3 }
  0x34   :  { %162 = vadd.xlane.f32.xlu1 %v161_v51 }
  0x36   :  { %165 = vadd.xlane.f32.xlu0 %v164_v53  ;;  %v266_v53 = vsub.s32 6, %v638_v3 }
  0x38   :  { %168 = vadd.xlane.f32.xlu1 %v167_v54 }
  0xb3   :  { %v148_v55 = vpop.xlane.xlu0 %147 }
  0xb4   :  { %v170_v57 = vmul.f32 0.125, %v148_v55 }
  0xb5   :  { %v154_v56 = vpop.xlane.xlu1 %153 }
  0xb6   :  { %v172_v58 = vmul.f32 0.125, %v154_v56  ;;  %v191_v62 = vrot.slane %v170_v57, %v641_v6  ;;  %v270_v56 = vsub.s32 7, %v638_v3 }
  0xb7   :  { %v151_v59 = vpop.xlane.xlu0 %150 }
  0xb8   :  { %v171_v60 = vmul.f32 0.125, %v151_v59  ;;  %v199_v1 = vrot.slane %v172_v58, %v641_v6 }
  0xb9   :  { %v157_v61 = vpop.xlane.xlu1 %156 }
  0xba   :  { %v195_v63 = vrot.slane %v171_v60, %v641_v6  ;;  %v173_v0 = vmul.f32 0.125, %v157_v61 }
  0xbb   :  { %v160_v2 = vpop.xlane.xlu0 %159 }
  0xbc   :  { %v221_v4 = vsel %vm220_vm1, %v195_v63, %v191_v62  ;;  %v203_v5 = vrot.slane %v173_v0, %v641_v6  ;;  %v174_v7 = vmul.f32 0.125, %v160_v2 }
  0xbd   :  { %v223_v8 = vsel %vm222_vm2, %v199_v1, %v221_v4  ;;  %v163_v9 = vpop.xlane.xlu1 %162 }
  0xbe   :  { %v225_v10 = vsel %vm224_vm3, %v203_v5, %v223_v8  ;;  %v207_v12 = vrot.slane %v174_v7, %v641_v6  ;;  %v175_v13 = vmul.f32 0.125, %v163_v9 }
  0xbf   :  { %v166_v14 = vpop.xlane.xlu0 %165 }
  0xc0   :  { %v227_v16 = vsel %vm226_vm4, %v207_v12, %v225_v10  ;;  %v211_v17 = vrot.slane %v175_v13, %v641_v6  ;;  %v176_v18 = vmul.f32 0.125, %v166_v14 }
  0xc1   :  { %v169_v19 = vpop.xlane.xlu1 %168 }
  0xc2   :  { %v215_v22 = vrot.slane %v176_v18, %v641_v6  ;;  %v177_v23 = vmul.f32 0.125, %v169_v19  ;;  %v229_v24 = vsel %vm228_vm5, %v211_v17, %v227_v16 }
  0xc4   :  { %v219_v25 = vrot.slane %v177_v23, %v641_v6  ;;  %v231_v26 = vsel %vm230_vm6, %v215_v22, %v229_v24 }
  0xc6   :  { %v233_v29 = vsel %vm232_vm7, %v219_v25, %v231_v26 }
  0xc7   :  { %v236_v30 = vsel %vm235_vm8, %v233_v29, -inf }
  0xc8   :  { %237 = vmax.xlane.f32.xlu0 %v236_v30 }
 0x151   :  { %v238_v35 = vpop.xlane.xlu0 %237 }
 0x152   :  { %v243_v36 = vrot.slane %v238_v35, %v645_v11  ;;  %v247_v38 = vrot.slane %v238_v35, %v246_v32  ;;  %v251_v39 = vrot.slane %v238_v35, %v250_v33  ;;  %v255_v41 = vrot.slane %v238_v35, %v254_v34 }
 0x153   :  { %v259_v50 = vrot.slane %v238_v35, %v258_v40  ;;  %v263_v11 = vrot.slane %v238_v35, %v262_v49 }
 0x154   :  { %v280_v42 = vsub.f32 %v170_v57, %v243_v36  ;;  %v281_v43 = vsub.f32 %v171_v60, %v247_v38  ;;  %v282_v45 = vsub.f32 %v172_v58, %v251_v39  ;;  %v283_v51 = vsub.f32 %v173_v0, %v255_v41 }
 0x155   :  { %v284_v54 = vsub.f32 %v174_v7, %v259_v50  ;;  %v267_v57 = vrot.slane %v238_v35, %v266_v53  ;;  %v285_v59 = vsub.f32 %v175_v13, %v263_v11  ;;  %v271_v60 = vrot.slane %v238_v35, %v270_v56 }
 0x156   :  { %v288_v46 = vmul.f32 1.442695, %v280_v42  ;;  %v290_v47 = vmul.f32 1.442695, %v281_v43  ;;  %v292_v52 = vmul.f32 1.442695, %v282_v45 }
 0x157   :  { %v294_v55 = vmul.f32 1.442695, %v283_v51  ;;  %v296_v58 = vmul.f32 1.442695, %v284_v54  ;;  %v286_v61 = vsub.f32 %v176_v18, %v267_v57  ;;  %v298_v62 = vmul.f32 1.442695, %v285_v59 }
 0x158   :  { %526 = vpow2.f32 %v288_v46  ;;  %v287_v1 = vsub.f32 %v177_v23, %v271_v60 }
 0x159   :  { %528 = vpow2.f32 %v290_v47  ;;  %v300_v2 = vmul.f32 1.442695, %v286_v61 }
 0x15a   :  { %530 = vpow2.f32 %v292_v52  ;;  %v302_v5 = vmul.f32 1.442695, %v287_v1 }
 0x15b   :  { %532 = vpow2.f32 %v294_v55 }
 0x15c   :  { %534 = vpow2.f32 %v296_v58 }
 0x15d   :  { %536 = vpow2.f32 %v298_v62 }
 0x15e   :  { %538 = vpow2.f32 %v300_v2 }
 0x15f   :  { %540 = vpow2.f32 %v302_v5 }
 0x165   :  { %v527_v63 = vpop.eup %526 }
 0x166   :  { %v529_v0 = vpop.eup %528  ;;  %313 = vperm.xlu1 %523, %v527_v63  }
 0x167   :  { %316 = vperm.xlu0 %524, %v529_v0   ;;  %v531_v4 = vpop.eup %530 }
 0x168   :  { %v533_v3 = vpop.eup %532 }
 0x169   :  { %v535_v7 = vpop.eup %534 }
 0x16a   :  { %319 = vperm.xlu1 %523, %v531_v4   ;;  %v537_v8 = vpop.eup %536 }
 0x16b   :  { %v539_v9 = vpop.eup %538 }
 0x16c   :  { %v541_v10 = vpop.eup %540 }
 0x16e   :  { %322 = vperm.xlu1 %523, %v533_v3  }
 0x172   :  { %325 = vperm.xlu1 %523, %v535_v7  }
 0x176   :  { %328 = vperm.xlu1 %523, %v537_v8  }
 0x17a   :  { %331 = vperm.xlu1 %523, %v539_v9  }
 0x17e   :  { %334 = vperm.xlu1 %523, %v541_v10  }
 0x1e1   :  { %v314_v12 = vpop.permute.xlu1 %313 }
 0x1e2   :  { %v317_v17 = vpop.permute.xlu0 %316  ;;  %v339_v22 = vrot.slane %v314_v12, %v641_v6  ;;  %v387_v43 = vmul.f32 %v314_v12, %v647_v15 }
 0x1e3   :  { %v343_v19 = vrot.slane %v317_v17, %v641_v6  ;;  %v388_v42 = vmul.f32 %v317_v17, %v652_v21 }
 0x1e4   :  { %v395_v50 = vsel %vm145_vm0, %v387_v43, 0.0 }
 0x1e5   :  { %v320_v13 = vpop.permute.xlu1 %319  ;;  %v368_v29 = vsel %vm220_vm1, %v343_v19, %v339_v22  ;;  %v402_v49 = vsel %vm145_vm0, %v388_v42, 0.0 }
 0x1e6   :  { %v347_v23 = vrot.slane %v320_v13, %v641_v6  ;;  %v389_v45 = vmul.f32 %v320_v13, %v650_v20  ;;  %v403_v53 = vrot.slane %v402_v49, 4  ;;  %v396_v20 = vrot.slane %v395_v50, 4 }
 0x1e8   :  { %v369_v31 = vsel %vm222_vm2, %v347_v23, %v368_v29  ;;  %v409_v51 = vsel %vm145_vm0, %v389_v45, 0.0  ;;  %v404_v59 = vadd.f32 %v403_v53, %v402_v49  ;;  %v397_v58 = vadd.f32 %v396_v20, %v395_v50 }
 0x1e9   :  { %v323_v14 = vpop.permute.xlu1 %322  ;;  %v410_v11 = vrot.slane %v409_v51, 4 }
 0x1ea   :  { %v351_v24 = vrot.slane %v323_v14, %v641_v6  ;;  %v390_v46 = vmul.f32 %v323_v14, %v659_v28  ;;  %v405_v1 = vrot.slane %v404_v59, 2  ;;  %v398_v2 = vrot.slane %v397_v58, 2 }
 0x1eb   :  { %v411_v60 = vadd.f32 %v410_v11, %v409_v51 }
 0x1ec   :  { %v370_v33 = vsel %vm224_vm3, %v351_v24, %v369_v31  ;;  %v416_v52 = vsel %vm145_vm0, %v390_v46, 0.0  ;;  %v406_v10 = vadd.f32 %v405_v1, %v404_v59  ;;  %v399_v12 = vadd.f32 %v398_v2, %v397_v58 }
 0x1ed   :  { %v326_v16 = vpop.permute.xlu1 %325  ;;  %v412_v4 = vrot.slane %v411_v60, 2 }
 0x1ee   :  { %v355_v25 = vrot.slane %v326_v16, %v641_v6  ;;  %v391_v47 = vmul.f32 %v326_v16, %v657_v27  ;;  %v407_v22 = vrot.slane %v406_v10, 1  ;;  %v400_v23 = vrot.slane %v399_v12, 1 }
 0x1ef   :  { %v413_v13 = vadd.f32 %v412_v4, %v411_v60 }
 0x1f0   :  { %v371_v34 = vsel %vm226_vm4, %v355_v25, %v370_v33  ;;  %v423_v28 = vsel %vm145_vm0, %v391_v47, 0.0  ;;  %v401_v33 = vadd.f32 %v400_v23, %v399_v12 }
 0x1f1   :  { %v329_v18 = vpop.permute.xlu1 %328  ;;  %v424_v56 = vrot.slane %v423_v28, 4  ;;  %v414_v24 = vrot.slane %v413_v13, 1 }
 0x1f2   :  { %v359_v30 = vrot.slane %v329_v18, %v641_v6 }
 0x1f3   :  { %v425_v62 = vadd.f32 %v424_v56, %v423_v28 }
 0x1f4   :  { %v372_v38 = vsel %vm228_vm5, %v359_v30, %v371_v34 }
 0x1f5   :  { %v332_v26 = vpop.permute.xlu1 %331  ;;  %v426_v8 = vrot.slane %v425_v62, 2 }
 0x1f6   :  { %v363_v32 = vrot.slane %v332_v26, %v641_v6  ;;  %v393_v21 = vmul.f32 %v332_v26, %v674_v44 }
 0x1f8   :  { %v373_v39 = vsel %vm230_vm6, %v363_v32, %v372_v38  ;;  %v437_v54 = vsel %vm145_vm0, %v393_v21, 0.0  ;;  %v408_v32 = vadd.f32 %v407_v22, %v406_v10 }
 0x1f9   :  { %v335_v35 = vpop.permute.xlu1 %334  ;;  %v438_v61 = vrot.slane %v437_v54, 4 }
 0x1fa   :  { %v367_v36 = vrot.slane %v335_v35, %v641_v6  ;;  %v392_v6 = vmul.f32 %v329_v18, %v667_v37  ;;  %v394_v15 = vmul.f32 %v335_v35, %v679_v48  ;;  %v417_v37 = vrot.slane %v416_v52, 4 }
 0x1fb   :  { %v439_v3 = vadd.f32 %v438_v61, %v437_v54  ;;  %v427_v18 = vadd.f32 %v426_v8, %v425_v62  ;;  %v415_v35 = vadd.f32 %v414_v24, %v413_v13 }
 0x1fc   :  { %v374_v40 = vsel %vm232_vm7, %v367_v36, %v373_v39  ;;  %v430_v27 = vsel %vm145_vm0, %v392_v6, 0.0  ;;  %v444_v55 = vsel %vm145_vm0, %v394_v15, 0.0  ;;  %v418_v44 = vadd.f32 %v417_v37, %v416_v52 }
 0x1fd   :  { %v376_v41 = vsel %vm235_vm8, %v374_v40, 0.0  ;;  %v431_v57 = vrot.slane %v430_v27, 4  ;;  %v445_v48 = vrot.slane %v444_v55, 4  ;;  %v440_v16 = vrot.slane %v439_v3, 2 }
 0x1fe   :  { %377 = vadd.xlane.f32.xlu1 %v376_v41  ;;  %v419_v5 = vrot.slane %v418_v44, 2  ;;  %v428_v30 = vrot.slane %v427_v18, 1 }
 0x1ff   :  { %v432_v63 = vadd.f32 %v431_v57, %v430_v27  ;;  %v446_v7 = vadd.f32 %v445_v48, %v444_v55  ;;  %v441_v26 = vadd.f32 %v440_v16, %v439_v3 }
 0x200   :  { %v420_v14 = vadd.f32 %v419_v5, %v418_v44  ;;  %v429_v45 = vadd.f32 %v428_v30, %v427_v18 }
 0x201   :  { %v433_v9 = vrot.slane %v432_v63, 2  ;;  %v447_v17 = vrot.slane %v446_v7, 2  ;;  %v442_v38 = vrot.slane %v441_v26, 1 }
 0x202   :  { %v421_v25 = vrot.slane %v420_v14, 1 }
 0x203   :  { %v434_v19 = vadd.f32 %v433_v9, %v432_v63  ;;  %v448_v29 = vadd.f32 %v447_v17, %v446_v7  ;;  %v443_v21 = vadd.f32 %v442_v38, %v441_v26 }
 0x204   :  { %v422_v36 = vadd.f32 %v421_v25, %v420_v14 }
 0x205   :  { %v435_v31 = vrot.slane %v434_v19, 1  ;;  %v449_v39 = vrot.slane %v448_v29, 1 }
 0x207   :  { %v436_v46 = vadd.f32 %v435_v31, %v434_v19  ;;  %v450_v15 = vadd.f32 %v449_v39, %v448_v29 }
 0x287   :  { %v378_v0 = vpop.xlane.xlu1 %377 }
 0x288   :  { %542 = vrcp.f32 %v378_v0 }
 0x295   :  { %v543_v34 = vpop.eup %542 }
 0x296   :  { %v453_v40 = vrot.slane %v543_v34, 1  ;;  %v454_v41 = vrot.slane %v543_v34, 2  ;;  %v455_v42 = vrot.slane %v543_v34, 3  ;;  %v456_v43 = vrot.slane %v543_v34, 4 }
 0x297   :  { %v457_v47 = vrot.slane %v543_v34, 5  ;;  %v458_v6 = vrot.slane %v543_v34, 6  ;;  %v459_v49 = vrot.slane %v543_v34, 7  ;;  %v468_v20 = vmul.f32 %v543_v34, %v401_v33 }
 0x298   :  { %v469_v50 = vmul.f32 %v453_v40, %v408_v32  ;;  %v470_v51 = vmul.f32 %v454_v41, %v415_v35  ;;  %v471_v52 = vmul.f32 %v455_v42, %v422_v36  ;;  %v472_v53 = vmul.f32 %v456_v43, %v429_v45 }
 0x299   :  { %v473_v28 = vmul.f32 %v457_v47, %v436_v46  ;;  %v474_v37 = vmul.f32 %v458_v6, %v443_v21  ;;  %v475_v54 = vmul.f32 %v459_v49, %v450_v15 }
 0x29a   :  { %v484_v27 = vrot.slane %v469_v50, 7  ;;  %v486_v11 = vrot.slane %v470_v51, 6  ;;  %v488_v56 = vrot.slane %v471_v52, 5  ;;  %v490_v59 = vrot.slane %v472_v53, 4 }
 0x29b   :  { %v492_v60 = vrot.slane %v473_v28, 3  ;;  %v494_v61 = vrot.slane %v474_v37, 2  ;;  %v496_v62 = vrot.slane %v475_v54, 1 }
 0x29c   :  { %v485_v55 = vsel %vm220_vm1, %v484_v27, %v468_v20 }
 0x29d   :  { %v487_v57 = vsel %vm222_vm2, %v486_v11, %v485_v55 }
 0x29e   :  { %v489_v58 = vsel %vm224_vm3, %v488_v56, %v487_v57 }
 0x29f   :  { %v491_v44 = vsel %vm226_vm4, %v490_v59, %v489_v58 }
 0x2a0   :  { %v493_v48 = vsel %vm228_vm5, %v492_v60, %v491_v44 }
 0x2a1   :  { %v495_v63 = vsel %vm230_vm6, %v494_v61, %v493_v48 }
 0x2a2   :  { %v497_v0 = vsel %vm232_vm7, %v496_v62, %v495_v63 }
 0x2a3   :  { %499 = vst.msk [vmem:[#allocation7] sm:$0xff] %vm145_vm0, %v497_v0 }
 0x2a4   :  { %595 = shalt.err (!%p592_p0)
}
 0x2a5   :  { %509 = dma.vmem_to_hbm [thread:$0]  %s507_s1, 128, %s756_s2, [#allocation4]  }
 0x2a6   :  { %608 = dma.done.wait [#allocation4], 128  }
 0x2a7   :  { %609 = vsyncadd [#allocation4], 4294967168 }
 0x2a8   :  { %513 = vsyncpa [#allocation3], 1 }
 0x2a9   :  { %514 = vsyncpa [#allocation6], 1 }
 0x2aa   :  { %515 = vsyncpa [#allocation4], 1 }

</bundles_post_ra>
